<compile_context>
chip_gen: v7x
topology: tpu7x:2x2x1
jax: 0.10.0
libtpu: 0.0.40
codegen_flags: <defaults>
</compile_context>

<pallas_src>
import math

import jax
import jax.numpy as jnp
from jax.experimental import pallas as pl
from jax.experimental.pallas import tpu as pltpu

_LANE = 128


def _round_up(x, m):
    return ((x + m - 1) // m) * m


def _mlp_kernel(t_ref, w2t_ref, p_ref, w3_ref, o_ref):
    t = t_ref[...]                                   # (1, TN)

    # Packed parameter columns: [w1 | b1 | b2 | b3-broadcast]
    w1 = p_ref[:, 0:1]                               # (H, 1)
    b1 = p_ref[:, 1:2]                               # (H, 1)
    b2 = p_ref[:, 2:3]                               # (H, 1)
    b3 = p_ref[0:1, 3:4]                             # (1, 1)

    # Layer 1: Linear(1 -> H) + ReLU.  K=1 matmul is degenerate on the MXU;
    # do the outer-product broadcast on the VPU instead.
    h1 = jnp.maximum(w1 * t + b1, 0.0)               # (H, TN)

    # Layer 2: Linear(H -> H) + ReLU.  The main matmul -> MXU, lane-dense result.
    h2 = jnp.dot(w2t_ref[...], h1, preferred_element_type=jnp.float32)
    h2 = jnp.maximum(h2 + b2, 0.0)                   # (H, TN)

    # Layer 3: Linear(H -> 1) as a (1,H)@(H,TN) MXU matmul (result is one
    # sublane row x TN lanes, still lane-dense), relieving the VPU/XLU.
    y = jnp.dot(w3_ref[...], h2, preferred_element_type=jnp.float32) + b3  # (1, TN)

    # Sigmoid via tanh: transcendental rides the EUP slot, no f32 divide.
    o_ref[...] = 0.5 * (jnp.tanh(0.5 * y) + 1.0)


def complex_time_scaling(time_gaps, params, *, row_tile=16384):
    """time_gaps: arbitrary shape (...,) -> (..., 1) f32 (matches torch)."""
    w1, b1, w2, b2, w3, b3 = params
    H = w2.shape[0]
    lead_shape = time_gaps.shape
    N = int(math.prod(lead_shape)) if lead_shape else 1

    if N == 0:  # empty input: zero-size grid is not valid, short-circuit.
        return jnp.zeros(lead_shape + (1,), jnp.float32)

    n_pad_min = _round_up(N, _LANE)

    # --- tile selection -------------------------------------------------
    # VMEM bytes per lane-column of tile:
    #   in+out, double-buffered, sublane-padded to 8:  2*2*8*4 B
    #   h1/h2 (+temp headroom) f32 intermediates:      3*H*4   B
    per_col_bytes = 2 * 2 * 8 * 4 + 3 * H * 4
    vmem_budget = 24 << 20            # conservative: fits v7x's 64 MiB VMEM
    vmem_tile_cap = max(_LANE, (vmem_budget // per_col_bytes) // _LANE * _LANE)

    tile = min(_round_up(row_tile, _LANE), vmem_tile_cap)
    if n_pad_min >= 2 * _LANE:
        # Ensure >= 2 grid steps so the "parallel" axis can shard across the
        # two v7x TensorCores (no-op on v5e/v6e, 1 TC).
        tile = min(tile, _round_up((n_pad_min + 1) // 2, _LANE))
    else:
        tile = _LANE
    n_pad = _round_up(N, tile)

    # --- inputs (wrapper-side relayout is one-time) -----------------------
    t_flat = time_gaps.reshape(-1).astype(jnp.float32)
    if n_pad != N:
        t_flat = jnp.pad(t_flat, (0, n_pad - N))
    t_row = t_flat.reshape(1, n_pad)

    w2t = jnp.asarray(w2, jnp.float32).T              # (in,out) -> (out,in)
    w3r = jnp.asarray(w3, jnp.float32).reshape(1, H)  # (H,1) -> (1,H)
    pvec = jnp.concatenate(
        [jnp.asarray(w1, jnp.float32).reshape(H, 1),
         jnp.asarray(b1, jnp.float32).reshape(H, 1),
         jnp.asarray(b2, jnp.float32).reshape(H, 1),
         jnp.broadcast_to(jnp.asarray(b3, jnp.float32).reshape(1, 1), (H, 1))],
        axis=1)                                       # (H, 4) packed params

    # Explicit VMEM budget (double-buffered I/O + compiler scratch for h1/h2).
    vmem_est = 2 * 2 * 8 * tile * 4 + 3 * H * tile * 4 + 8 * H * _LANE * 4
    vmem_limit = int(min(max(int(vmem_est * 1.25), 32 << 20), 48 << 20))

    grid = (n_pad // tile,)
    out = pl.pallas_call(
        _mlp_kernel,
        out_shape=jax.ShapeDtypeStruct((1, n_pad), jnp.float32),
        grid_spec=pltpu.PrefetchScalarGridSpec(
            num_scalar_prefetch=0,
            grid=grid,
            in_specs=[
                pl.BlockSpec((1, tile), lambda i: (0, i)),   # time-gap tile
                pl.BlockSpec((H, H), lambda i: (0, 0)),      # W2^T
                pl.BlockSpec((H, 4), lambda i: (0, 0)),      # packed [w1,b1,b2,b3]
                pl.BlockSpec((1, H), lambda i: (0, 0)),      # W3 row
            ],
            out_specs=pl.BlockSpec((1, tile), lambda i: (0, i)),
        ),
        compiler_params=pltpu.CompilerParams(
            dimension_semantics=("parallel",),    # megacore-shardable row axis
            vmem_limit_bytes=vmem_limit),
    )(t_row, w2t, pvec, w3r)

    out_flat = out[0]
    if n_pad != N:
        out_flat = out_flat[:N]
    return out_flat.reshape(lead_shape + (1,))


def init_params(key, hidden_dim=64):
    """Deterministic init mirroring torch.nn.Linear's U(-1/sqrt(fan_in), +).

    Weights are stored (in_dim, out_dim) — i.e. transposed vs torch's (out,in).
    """
    ks = jax.random.split(key, 6)

    def lin(kw, kb, fan_in, fan_out):
        bound = 1.0 / math.sqrt(fan_in)
        w = jax.random.uniform(kw, (fan_in, fan_out), jnp.float32, -bound, bound)
        b = jax.random.uniform(kb, (1, fan_out), jnp.float32, -bound, bound)
        return w, b

    w1, b1 = lin(ks[0], ks[1], 1, hidden_dim)
    w2, b2 = lin(ks[2], ks[3], hidden_dim, hidden_dim)
    w3, b3 = lin(ks[4], ks[5], hidden_dim, 1)
    return (w1, b1, w2, b2, w3, b3)


def _reference(time_gaps, params):
    w1, b1, w2, b2, w3, b3 = params
    x = time_gaps[..., None]
    h = jnp.maximum(x @ w1 + b1, 0.0)
    h = jnp.maximum(h @ w2 + b2, 0.0)
    return jax.nn.sigmoid(h @ w3 + b3)


if __name__ == "__main__":
    key = jax.random.PRNGKey(0)
    k_param, k_data, k_data2 = jax.random.split(key, 3)

    hidden_dim = 32
    params = init_params(k_param, hidden_dim)

    # Small primary case: time_gaps (batch=2, seq=8) -> out (2, 8, 1).
    B, S = 2, 8
    time_gaps = jax.random.uniform(k_data, (B, S), jnp.float32, 0.0, 10.0)
    out = jax.block_until_ready(complex_time_scaling(time_gaps, params))
    ref = _reference(time_gaps, params)
    assert out.shape == (B, S, 1)
    assert jnp.allclose(out, ref, atol=1e-5, rtol=1e-5), "mismatch vs reference (small)"

    # Secondary case: exercises padding + a multi-step (megacore-shardable) grid.
    time_gaps2 = jax.random.uniform(k_data2, (3, 200), jnp.float32, 0.0, 10.0)
    out2 = jax.block_until_ready(complex_time_scaling(time_gaps2, params))
    ref2 = _reference(time_gaps2, params)
    assert out2.shape == (3, 200, 1)
    assert jnp.allclose(out2, ref2, atol=1e-5, rtol=1e-5), "mismatch vs reference (padded)"

    print("KERNEL_OK")
</pallas_src>

<mosaic_0001>
module attributes {stable_mosaic.version = 11 : i64} {
  func.func @_mlp_kernel(%arg0: i32, %arg1: memref<1x128xf32, #tpu.memory_space<vmem>>, %arg2: memref<32x32xf32, #tpu.memory_space<vmem>>, %arg3: memref<32x4xf32, #tpu.memory_space<vmem>>, %arg4: memref<1x32xf32, #tpu.memory_space<vmem>>, %arg5: memref<1x128xf32, #tpu.memory_space<vmem>>) attributes {dimension_semantics = [#tpu.dimension_semantics<parallel>], iteration_bounds = array<i64: 1>, scalar_prefetch = 0 : i64, scratch_operands = 0 : i64, tpu.core_type = #tpu.core_type<tc>, window_params = [{transform_indices = @transform_0, window_bounds = array<i64: 1, 128>}, {pipeline_mode = #tpu.pipeline_mode<synchronous>, transform_indices = @transform_1, window_bounds = array<i64: 32, 32>}, {pipeline_mode = #tpu.pipeline_mode<synchronous>, transform_indices = @transform_2, window_bounds = array<i64: 32, 4>}, {pipeline_mode = #tpu.pipeline_mode<synchronous>, transform_indices = @transform_3, window_bounds = array<i64: 1, 32>}, {transform_indices = @transform_4, window_bounds = array<i64: 1, 128>}]} {
    %c0 = arith.constant 0 : index
    %c0_0 = arith.constant 0 : index
    %0 = vector.load %arg1[%c0, %c0_0] : memref<1x128xf32, #tpu.memory_space<vmem>>, vector<1x128xf32>
    %c0_1 = arith.constant 0 : index
    %c0_2 = arith.constant 0 : index
    %1 = vector.load %arg3[%c0_1, %c0_2] : memref<32x4xf32, #tpu.memory_space<vmem>>, vector<32x1xf32>
    %c0_3 = arith.constant 0 : index
    %c1 = arith.constant 1 : index
    %2 = vector.load %arg3[%c0_3, %c1] : memref<32x4xf32, #tpu.memory_space<vmem>>, vector<32x1xf32>
    %c0_4 = arith.constant 0 : index
    %c2 = arith.constant 2 : index
    %3 = vector.load %arg3[%c0_4, %c2] : memref<32x4xf32, #tpu.memory_space<vmem>>, vector<32x1xf32>
    %c0_5 = arith.constant 0 : index
    %c3 = arith.constant 3 : index
    %4 = vector.load %arg3[%c0_5, %c3] : memref<32x4xf32, #tpu.memory_space<vmem>>, vector<1x1xf32>
    %5 = vector.broadcast %1 : vector<32x1xf32> to vector<32x128xf32>
    %6 = vector.broadcast %0 : vector<1x128xf32> to vector<32x128xf32>
    %7 = arith.mulf %5, %6 : vector<32x128xf32>
    %8 = vector.broadcast %2 : vector<32x1xf32> to vector<32x128xf32>
    %9 = arith.addf %7, %8 : vector<32x128xf32>
    %cst = arith.constant 0.000000e+00 : f32
    %10 = vector.broadcast %cst : f32 to vector<32x128xf32>
    %11 = arith.maximumf %9, %10 : vector<32x128xf32>
    %c0_6 = arith.constant 0 : index
    %c0_7 = arith.constant 0 : index
    %12 = vector.load %arg2[%c0_6, %c0_7] : memref<32x32xf32, #tpu.memory_space<vmem>>, vector<32x32xf32>
    %cst_8 = arith.constant dense<0.000000e+00> : vector<32x128xf32>
    %13 = tpu.matmul %12, %11, %cst_8 {dimension_numbers = #tpu.dot_dimension_numbers<[1], [0], [0], [1], [0, 0, 1, 1], [], []>} : vector<32x32xf32>, vector<32x128xf32>, vector<32x128xf32> -> vector<32x128xf32>
    %14 = vector.broadcast %3 : vector<32x1xf32> to vector<32x128xf32>
    %15 = arith.addf %13, %14 : vector<32x128xf32>
    %cst_9 = arith.constant 0.000000e+00 : f32
    %16 = vector.broadcast %cst_9 : f32 to vector<32x128xf32>
    %17 = arith.maximumf %15, %16 : vector<32x128xf32>
    %c0_10 = arith.constant 0 : index
    %c0_11 = arith.constant 0 : index
    %18 = vector.load %arg4[%c0_10, %c0_11] : memref<1x32xf32, #tpu.memory_space<vmem>>, vector<1x32xf32>
    %cst_12 = arith.constant dense<0.000000e+00> : vector<1x128xf32>
    %19 = tpu.matmul %18, %17, %cst_12 {dimension_numbers = #tpu.dot_dimension_numbers<[1], [0], [0], [1], [0, 0, 1, 1], [], []>} : vector<1x32xf32>, vector<32x128xf32>, vector<1x128xf32> -> vector<1x128xf32>
    %20 = vector.broadcast %4 : vector<1x1xf32> to vector<1x128xf32>
    %21 = arith.addf %19, %20 : vector<1x128xf32>
    %cst_13 = arith.constant 5.000000e-01 : f32
    %22 = vector.broadcast %cst_13 : f32 to vector<1x128xf32>
    %23 = arith.mulf %22, %21 : vector<1x128xf32>
    %24 = math.tanh %23 : vector<1x128xf32>
    %cst_14 = arith.constant 1.000000e+00 : f32
    %25 = vector.broadcast %cst_14 : f32 to vector<1x128xf32>
    %26 = arith.addf %24, %25 : vector<1x128xf32>
    %cst_15 = arith.constant 5.000000e-01 : f32
    %27 = vector.broadcast %cst_15 : f32 to vector<1x128xf32>
    %28 = arith.mulf %27, %26 : vector<1x128xf32>
    %c0_16 = arith.constant 0 : index
    %c0_17 = arith.constant 0 : index
    %29 = vector.load %arg5[%c0_16, %c0_17] : memref<1x128xf32, #tpu.memory_space<vmem>>, vector<1x128xf32>
    tpu.vector_store %arg5[%c0_16, %c0_17], %28 {strides = array<i32>} : memref<1x128xf32, #tpu.memory_space<vmem>>, vector<1x128xf32>,
    return
  }
  func.func @transform_0(%arg0: i32) -> (i32, i32) {
    %c0_i32 = arith.constant 0 : i32
    %c0_i32_0 = arith.constant 0 : i32
    return %c0_i32, %arg0 : i32, i32
  }
  func.func @transform_1(%arg0: i32) -> (i32, i32) {
    %c0_i32 = arith.constant 0 : i32
    %c0_i32_0 = arith.constant 0 : i32
    %c0_i32_1 = arith.constant 0 : i32
    return %c0_i32, %c0_i32_0 : i32, i32
  }
  func.func @transform_2(%arg0: i32) -> (i32, i32) {
    %c0_i32 = arith.constant 0 : i32
    %c0_i32_0 = arith.constant 0 : i32
    %c0_i32_1 = arith.constant 0 : i32
    return %c0_i32, %c0_i32_0 : i32, i32
  }
  func.func @transform_3(%arg0: i32) -> (i32, i32) {
    %c0_i32 = arith.constant 0 : i32
    %c0_i32_0 = arith.constant 0 : i32
    %c0_i32_1 = arith.constant 0 : i32
    return %c0_i32, %c0_i32_0 : i32, i32
  }
  func.func @transform_4(%arg0: i32) -> (i32, i32) {
    %c0_i32 = arith.constant 0 : i32
    %c0_i32_0 = arith.constant 0 : i32
    return %c0_i32, %arg0 : i32, i32
  }
}

</mosaic_0001>

<bundles_post_ra>
// kernel: tpu_custom_call.1
= control target key start
LH: loop header
LB: loop body
LE: loop exit
PB: predicated region body
PF: predicated region fallthrough
CT: control target
= control target key end

     0   :  { %v398_v1 = vmov 1   ;;  %v399_v2 = vmov 0   ;;  %s481_s0 = inlined_call_operand.vmem [shape: f32[1,128], index: 0, kind: input, shape index: {}]   ;;  %s482_s1 = inlined_call_operand.vmem [shape: f32[32,32], index: 1, kind: input, shape index: {}]   ;;  %s483_s2 = inlined_call_operand.vmem [shape: f32[32,4], index: 2, kind: input, shape index: {}]   ;;  %s484_s3 = inlined_call_operand.vmem [shape: f32[1,32], index: 3, kind: input, shape index: {}]   ;;  %s485_s4 = inlined_call_operand.hbm [shape: f32[1,128], index: 4, kind: output, shape index: {}]  }
   0x1   :  { %v19_v0 = vld [vmem:[%s483_s2] sm:$0xff]  ;;  %365 = vset.pattern.permute.xlu1 %v398_v1  ;;  %364 = vset.pattern.permute.xlu0 %v399_v2 }
   0x2   :  { %9 = vsyncpa [#allocation3], 0  ;;  %55 = vperm.xlu1 %365, %v19_v0   ;;  %26 = vperm.xlu0 %364, %v19_v0   ;;  %v20_v3 = vld [vmem:[%s483_s2 + $0x8] sm:$0xff]  ;;  %v21_v4 = vld [vmem:[%s483_s2 + $0x10] sm:$0xff]  ;;  %vm98_vm0 = vcmask 261120   ;;  %v400_v7 = vmov 2  }
   0x3   :  { %v22_v5 = vld [vmem:[%s483_s2 + $0x18] sm:$0xff]  ;;  %v78_v6 = vld [vmem:[%s482_s1] sm:$0xff]  ;;  %v79_v31 = vld [vmem:[%s482_s1 + $0x8] sm:$0xff]  ;;  %v401_v34 = vmov 0.0|0.0   ;;  %vm402_vm1 = vmmov 0   ;;  %v403_v35 = vmov 0.0  }
   0x4   :  { %325 = vmatprep.mubr.msk.f32.mxu0 %vm98_vm0, %v78_v6  ;;  %v298_v8 = vld [vmem:[%s481_s0] ss:$0 sm:$0xff]  ;;  %v80_v32 = vld [vmem:[%s482_s1 + $0x10] sm:$0xff]  ;;  %v81_v33 = vld [vmem:[%s482_s1 + $0x18] sm:$0xff]  ;;  %350 = vmatprep.subr.bf16.mxu1 %v401_v34  ;;  %v404_v37 = vmov 3   ;;  %s405_s8 = smov [#allocation2]  }
   0x5   :  { %339 = vmatprep.mubr.msk.f32.mxu1 %vm402_vm1, %v403_v35  ;;  %v23_v36 = vld [vmem:[%s483_s2] sm:$0x1]  ;;  %s290_s9 = sshll.u32 %s405_s8, 4  ;;  %s291_s9 = int_to_ptr.vmem [resolvable:$true] %s290_s9 }
   0x6   :  { %59 = vperm.xlu1 %365, %v20_v3   ;;  %31 = vperm.xlu0 %364, %v20_v3   ;;  %v200_v56 = vld [vmem:[%s484_s3] sm:$0x1]  ;;  %s374_s10 = scalar_lea.vmem %s291_s9, 16  ;;  %s378_s11 = scalar_lea.vmem %s291_s9, 32 }
   0x7   :  { %p375_p0 = scmp.ne.s32.totalorder %s291_s9, %s374_s10  ;;  %p379_p1 = scmp.lt.s32.totalorder %s291_s9, %s291_s9 }
   0x8   :  { %p380_p2 = scmp.lt.s32.totalorder %s378_s11, %s374_s10 }
   0xa   :  { %366 = vset.pattern.permute.xlu1 %v399_v2  ;;  %36 = vperm.xlu0 %364, %v21_v4   ;;  %p381_p3 = por %p380_p2, %p379_p1 }
   0xb   :  { %41 = vperm.xlu1 %366, %v22_v5  }
   0xc   :  { %p382_p4 = pnand %p381_p3, %p375_p0 }
   0xe   :  { %367 = vset.pattern.permute.xlu0 %v398_v1 }
   0xf   :  { %368 = vset.pattern.permute.xlu1 %v398_v1  ;;  %63 = vperm.xlu0 %367, %v21_v4  }
  0x10   :  { %67 = vperm.xlu1 %368, %v22_v5  }
  0x13   :  { %370 = vset.pattern.permute.xlu0 %v400_v7 }
  0x14   :  { %369 = vset.pattern.permute.xlu1 %v400_v7  ;;  %87 = vperm.xlu0 %370, %v20_v3  }
  0x15   :  { %83 = vperm.xlu1 %369, %v19_v0  }
  0x18   :  { %371 = vset.pattern.permute.xlu0 %v404_v37 }
  0x19   :  { %91 = vperm.xlu1 %369, %v21_v4   ;;  %203 = vperm.xlu0 %371, %v23_v36  }
  0x1d   :  { %95 = vperm.xlu1 %369, %v22_v5  }
  0x81   :  { %v56_v9 = vpop.permute.xlu1 %55  ;;  %v27_v10 = vpop.permute.xlu0 %26 }
  0x82   :  { %v50_v11 = vmul.f32 %v298_v8, %v27_v10 }
  0x84   :  { %v70_v14 = vadd.f32 %v56_v9, %v50_v11 }
  0x85   :  { %v60_v12 = vpop.permute.xlu1 %59  ;;  %v32_v13 = vpop.permute.xlu0 %31 }
  0x86   :  { %v51_v15 = vmul.f32 %v298_v8, %v32_v13  ;;  %v74_v18 = vmax.f32 %v70_v14, 0.0 }
  0x88   :  { %v71_v16 = vadd.f32 %v60_v12, %v51_v15 }
  0x89   :  { %v37_v17 = vpop.permute.xlu0 %36 }
  0x8a   :  { %v75_v19 = vmax.f32 %v71_v16, 0.0  ;;  %v42_v20 = vpop.permute.xlu1 %41  ;;  %v52_v22 = vmul.f32 %v298_v8, %v37_v17 }
  0x8b   :  { %v53_v23 = vmul.f32 %v298_v8, %v42_v20 }
  0x8c   :  { %v342_v21 = vpack.c.bf16 %v75_v19, %v74_v18 }
  0x8e   :  { %v64_v24 = vpop.permute.xlu0 %63  ;;  %343 = vmatprep.subr.bf16.mxu0 %v342_v21 }
  0x8f   :  { %v72_v25 = vadd.f32 %v64_v24, %v52_v22  ;;  %v68_v26 = vpop.permute.xlu1 %67  ;;  %345 = vmatpush3.bf16.msra.mxu0 %v342_v21 }
  0x90   :  { %v73_v27 = vadd.f32 %v68_v26, %v53_v23 }
  0x91   :  { %v76_v28 = vmax.f32 %v72_v25, 0.0 }
  0x92   :  { %v77_v29 = vmax.f32 %v73_v27, 0.0 }
  0x93   :  { %v88_v40 = vpop.permute.xlu0 %87 }
  0x94   :  { %v346_v30 = vpack.c.bf16 %v77_v29, %v76_v28  ;;  %v84_v38 = vpop.permute.xlu1 %83 }
  0x96   :  { %347 = vmatprep.subr.bf16.mxu0 %v346_v30 }
  0x97   :  { %349 = vmatpush3.bf16.msra.mxu0 %v346_v30 }
  0x98   :  { %v92_v39 = vpop.permute.xlu1 %91  ;;  %v204_v57 = vpop.permute.xlu0 %203 }
  0x9a   :  { %326 = vmatmul.mubr.msk.f32.vlgmr.msra.gmra.mrb[0].mxu0 %vm98_vm0, %v79_v31 }
  0x9b   :  { %328 = vmatprep.mubr.msk.f32.mxu0 %vm98_vm0, %v80_v32 }
  0x9c   :  { %v96_v46 = vpop.permute.xlu1 %95 }
  0x9e   :  { %329 = vmatmul.mubr.msk.f32.gmra.mrb[2].mxu0 %vm98_vm0, %v81_v33 }
 0x16d   :  { %v327_v41 = vpop.f32.mrb[0].mxu0 }
 0x16e   :  { %v183_v42 = vadd.f32 %v327_v41, %v88_v40  ;;  %v177_v43 = vpop.f32.mrb[1].mxu0 }
 0x16f   :  { %v178_v44 = vadd.f32 %v177_v43, %v84_v38 }
 0x170   :  { %v197_v45 = vmax.f32 %v183_v42, 0.0 }
 0x171   :  { %v196_v47 = vmax.f32 %v178_v44, 0.0  ;;  %v330_v48 = vpop.f32.mrb[2].mxu0 }
 0x172   :  { %v193_v49 = vadd.f32 %v330_v48, %v96_v46  ;;  %v187_v50 = vpop.f32.mrb[3].mxu0 }
 0x173   :  { %v188_v51 = vadd.f32 %v187_v50, %v92_v39  ;;  %v351_v52 = vpack.c.bf16 %v197_v45, %v196_v47 }
 0x174   :  { %v199_v53 = vmax.f32 %v193_v49, 0.0 }
 0x175   :  { %v198_v54 = vmax.f32 %v188_v51, 0.0  ;;  %352 = vmatpush3.bf16.msra.mxu1 %v351_v52 }
 0x176   :  { %353 = vmatprep.subr.bf16.mxu1 %v401_v34 }
 0x177   :  { %v354_v55 = vpack.c.bf16 %v199_v53, %v198_v54 }
 0x179   :  { %355 = vmatpush3.bf16.msra.mxu1 %v354_v55 }
 0x17c   :  { %340 = vmatmul.mubr.msk.f32.vlgmr.msra.gmra.mrb[0].mxu1 %vm98_vm0, %v200_v56 }
 0x24f   :  { %v275_v58 = vpop.f32.mrb[0].mxu1 }
 0x250   :  { %v276_v59 = vadd.f32 %v275_v58, %v204_v57  ;;  %v341_v60 = vpop.f32.mrb[1].mxu1 }
 0x252   :  { %v279_v61 = vmul.f32 0.5, %v276_v59 }
 0x254   :  { %372 = vtanh.f32 %v279_v61 }
 0x25e   :  { %v373_v62 = vpop.eup %372 }
 0x25f   :  { %v281_v63 = vadd.f32 1.0, %v373_v62 }
 0x261   :  { %v282_v0 = vmul.f32 0.5, %v281_v63 }
 0x263   :  { %283 = vst [vmem:[#allocation2] sm:$0x1] %v282_v0 }
 0x264   :  { %385 = shalt.err (!%p382_p4)
}
 0x265   :  { %s386_s13 = scalar_lea.hbm %s485_s4, 16 }
 0x266   :  { %p387_p5 = scmp.ne.s32.totalorder %s485_s4, %s386_s13  ;;  %p390_p6 = scmp.lt.u32.totalorder %s386_s13, %s485_s4 }
 0x268   :  { %p392_p7 = pnand %p390_p6, %p387_p5 }
 0x26a   :  { %395 = shalt.err (!%p392_p7)
}
 0x26b   :  { %293 = dma.vmem_to_hbm [thread:$0]  %s291_s9, 16, %s485_s4, [#allocation3]  }
 0x26c   :  { %396 = dma.done.wait [#allocation3], 16  }
 0x26d   :  { %397 = vsyncadd [#allocation3], 4294967280 }
 0x26e   :  { %297 = vsyncpa [#allocation3], 1 }

</bundles_post_ra>
